<compile_context>
chip_gen: v5e
topology: v5e:2x2
jax: 0.10.0
libtpu: 0.0.40
codegen_flags: <defaults>
</compile_context>

<pallas_src>
import jax
import jax.numpy as jnp
from jax.experimental import pallas as pl
from jax.experimental.pallas import tpu as pltpu

DIM_C = 10
DIM_IM = 784
DIM_IN = DIM_IM + DIM_C            # 794
DIM_IN_PAD = 896                   # 7 * 128 lane-aligned K
HIDDEN = 128
DIM_OUT = 1
B_ALIGN = 128                      # lane-dense output tile granularity


def d_kernel(x_ref, w1_ref, b1_ref, w2t_ref, b2_ref, o_ref):
    # Linear(794 -> 128): bf16 operands on the MXU, f32 accumulation.
    h = jnp.dot(x_ref[...], w1_ref[...], preferred_element_type=jnp.float32)
    # Bias + ReLU in f32 on the VPU (v5e has no bf16 VPU path).
    h = jnp.maximum(h + b1_ref[...], 0.0)                      # (tile_b, 128)
    # Linear(128 -> 1) emitted lane-dense: (1,128) x (tile_b,128)^K -> (1, tile_b)
    z = jax.lax.dot_general(
        w2t_ref[...], h,
        dimension_numbers=(((1,), (1,)), ((), ())),
        preferred_element_type=jnp.float32)
    z = z + b2_ref[0, 0]                                       # SMEM scalar bias
    o_ref[...] = jax.nn.sigmoid(z).astype(o_ref.dtype)


def d_forward(x, w1, b1, w2, b2, *, tile_b=512):
    """x: (B, 794) f32; w1: (794,128); b1: (1,128); w2: (128,1); b2: (1,1)."""
    B = x.shape[0]

    # Choose an effective batch tile: multiple of 128 (lane-dense output),
    # but don't over-pad small batches past a single grid step.
    tile_b = max(B_ALIGN, (tile_b // B_ALIGN) * B_ALIGN)
    min_pad = ((B + B_ALIGN - 1) // B_ALIGN) * B_ALIGN
    if min_pad <= tile_b:
        tile_b = min_pad
    b_pad = ((B + tile_b - 1) // tile_b) * tile_b
    grid = (b_pad // tile_b,)

    # Zero-pad batch rows and the K dim (zeros contribute nothing to the dot).
    x_p = jnp.pad(x.astype(jnp.float32),
                  ((0, b_pad - B), (0, DIM_IN_PAD - DIM_IN)))
    w1_p = jnp.pad(w1.astype(jnp.float32), ((0, DIM_IN_PAD - DIM_IN), (0, 0)))

    # bf16 only for MXU operands of the big matmul; accumulation stays f32.
    x_bf = x_p.astype(jnp.bfloat16)
    w1_bf = w1_p.astype(jnp.bfloat16)
    b1_f = b1.reshape(1, HIDDEN).astype(jnp.float32)
    w2t = w2.reshape(HIDDEN, DIM_OUT).T.astype(jnp.float32)     # (1, 128)
    b2_s = b2.reshape(1, 1).astype(jnp.float32)

    out = pl.pallas_call(
        d_kernel,
        out_shape=jax.ShapeDtypeStruct((1, b_pad), jnp.float32),
        grid_spec=pltpu.PrefetchScalarGridSpec(
            num_scalar_prefetch=0,
            grid=grid,
            in_specs=[
                pl.BlockSpec((tile_b, DIM_IN_PAD), lambda i: (i, 0)),  # x tile
                pl.BlockSpec((DIM_IN_PAD, HIDDEN), lambda i: (0, 0)),  # W1 (resident)
                pl.BlockSpec((1, HIDDEN), lambda i: (0, 0)),           # b1
                pl.BlockSpec((1, HIDDEN), lambda i: (0, 0)),           # W2^T
                pl.BlockSpec(memory_space=pltpu.MemorySpace.SMEM),     # b2 scalar
            ],
            out_specs=pl.BlockSpec((1, tile_b), lambda i: (0, i)),     # lane-dense
        ),
        compiler_params=pltpu.CompilerParams(
            dimension_semantics=("parallel",)),   # shards batch over v7x's 2 TCs
    )(x_bf, w1_bf, b1_f, w2t, b2_s)

    return out[0, :B].reshape(B, DIM_OUT)


def init_params(key):
    # PyTorch Linear default init: U(-1/sqrt(fan_in), 1/sqrt(fan_in))
    k1, k2, k3, k4 = jax.random.split(key, 4)
    lim1 = 1.0 / jnp.sqrt(DIM_IN)
    lim2 = 1.0 / jnp.sqrt(HIDDEN)
    w1 = jax.random.uniform(k1, (DIM_IN, HIDDEN), jnp.float32, -lim1, lim1)
    b1 = jax.random.uniform(k2, (1, HIDDEN), jnp.float32, -lim1, lim1)
    w2 = jax.random.uniform(k3, (HIDDEN, DIM_OUT), jnp.float32, -lim2, lim2)
    b2 = jax.random.uniform(k4, (1, DIM_OUT), jnp.float32, -lim2, lim2)
    return w1, b1, w2, b2


if __name__ == "__main__":
    key = jax.random.PRNGKey(0)
    kx, kp = jax.random.split(key)
    B = 16
    x = jax.random.normal(kx, (B, DIM_IN), jnp.float32)  # image(784) ++ cond(10)
    w1, b1, w2, b2 = init_params(kp)

    out = d_forward(x, w1, b1, w2, b2)
    out = jax.block_until_ready(out)

    # Full-f32 reference; bf16 first matmul keeps us well within 1e-2.
    ref = jax.nn.sigmoid(jnp.maximum(x @ w1 + b1, 0.0) @ w2 + b2)
    assert out.shape == (B, DIM_OUT)
    assert jnp.allclose(out, ref, atol=1e-2, rtol=1e-2), (
        float(jnp.max(jnp.abs(out - ref))))
    print("KERNEL_OK")
</pallas_src>

<mosaic_0001>
module attributes {stable_mosaic.version = 11 : i64} {
  func.func @d_kernel(%arg0: i32, %arg1: memref<128x896xbf16, #tpu.memory_space<vmem>>, %arg2: memref<896x128xbf16, #tpu.memory_space<vmem>>, %arg3: memref<1x128xf32, #tpu.memory_space<vmem>>, %arg4: memref<1x128xf32, #tpu.memory_space<vmem>>, %arg5: memref<1x1xf32, #tpu.memory_space<smem>>, %arg6: memref<1x128xf32, #tpu.memory_space<vmem>>) attributes {dimension_semantics = [#tpu.dimension_semantics<parallel>], iteration_bounds = array<i64: 1>, scalar_prefetch = 0 : i64, scratch_operands = 0 : i64, tpu.core_type = #tpu.core_type<tc>, window_params = [{transform_indices = @transform_0, window_bounds = array<i64: 128, 896>}, {pipeline_mode = #tpu.pipeline_mode<synchronous>, transform_indices = @transform_1, window_bounds = array<i64: 896, 128>}, {pipeline_mode = #tpu.pipeline_mode<synchronous>, transform_indices = @transform_2, window_bounds = array<i64: 1, 128>}, {pipeline_mode = #tpu.pipeline_mode<synchronous>, transform_indices = @transform_3, window_bounds = array<i64: 1, 128>}, {transform_indices = @transform_4, window_bounds = array<i64: 1, 1>}, {transform_indices = @transform_5, window_bounds = array<i64: 1, 128>}]} {
    %c0 = arith.constant 0 : index
    %c0_0 = arith.constant 0 : index
    %0 = vector.load %arg1[%c0, %c0_0] : memref<128x896xbf16, #tpu.memory_space<vmem>>, vector<128x896xbf16>
    %c0_1 = arith.constant 0 : index
    %c0_2 = arith.constant 0 : index
    %1 = vector.load %arg2[%c0_1, %c0_2] : memref<896x128xbf16, #tpu.memory_space<vmem>>, vector<896x128xbf16>
    %cst = arith.constant dense<0.000000e+00> : vector<128x128xf32>
    %2 = tpu.matmul %0, %1, %cst {dimension_numbers = #tpu.dot_dimension_numbers<[1], [0], [0], [1], [0, 0, 1, 1], [], []>} : vector<128x896xbf16>, vector<896x128xbf16>, vector<128x128xf32> -> vector<128x128xf32>
    %c0_3 = arith.constant 0 : index
    %c0_4 = arith.constant 0 : index
    %3 = vector.load %arg3[%c0_3, %c0_4] : memref<1x128xf32, #tpu.memory_space<vmem>>, vector<1x128xf32>
    %4 = vector.broadcast %3 : vector<1x128xf32> to vector<128x128xf32>
    %5 = arith.addf %2, %4 : vector<128x128xf32>
    %cst_5 = arith.constant 0.000000e+00 : f32
    %6 = vector.broadcast %cst_5 : f32 to vector<128x128xf32>
    %7 = arith.maximumf %5, %6 : vector<128x128xf32>
    %c0_6 = arith.constant 0 : index
    %c0_7 = arith.constant 0 : index
    %8 = vector.load %arg4[%c0_6, %c0_7] : memref<1x128xf32, #tpu.memory_space<vmem>>, vector<1x128xf32>
    %cst_8 = arith.constant dense<0.000000e+00> : vector<1x128xf32>
    %9 = tpu.matmul %8, %7, %cst_8 {dimension_numbers = #tpu.dot_dimension_numbers<[1], [1], [0], [0], [0, 0, 1, 0], [], []>} : vector<1x128xf32>, vector<128x128xf32>, vector<1x128xf32> -> vector<1x128xf32>
    %c0_9 = arith.constant 0 : index
    %c0_10 = arith.constant 0 : index
    %10 = memref.load %arg5[%c0_9, %c0_10] : memref<1x1xf32, #tpu.memory_space<smem>>
    %11 = vector.broadcast %10 : f32 to vector<1x128xf32>
    %12 = arith.addf %9, %11 : vector<1x128xf32>
    %13 = arith.negf %12 : vector<1x128xf32>
    %14 = math.exp %13 : vector<1x128xf32>
    %cst_11 = arith.constant 1.000000e+00 : f32
    %15 = vector.broadcast %cst_11 : f32 to vector<1x128xf32>
    %16 = arith.addf %15, %14 : vector<1x128xf32>
    %17 = arith.divf %15, %16 : vector<1x128xf32>
    %c0_12 = arith.constant 0 : index
    %c0_13 = arith.constant 0 : index
    %18 = vector.load %arg6[%c0_12, %c0_13] : memref<1x128xf32, #tpu.memory_space<vmem>>, vector<1x128xf32>
    tpu.vector_store %arg6[%c0_12, %c0_13], %17 {strides = array<i32>} : memref<1x128xf32, #tpu.memory_space<vmem>>, vector<1x128xf32>,
    return
  }
  func.func @transform_0(%arg0: i32) -> (i32, i32) {
    %c0_i32 = arith.constant 0 : i32
    %c0_i32_0 = arith.constant 0 : i32
    return %arg0, %c0_i32 : i32, i32
  }
  func.func @transform_1(%arg0: i32) -> (i32, i32) {
    %c0_i32 = arith.constant 0 : i32
    %c0_i32_0 = arith.constant 0 : i32
    %c0_i32_1 = arith.constant 0 : i32
    return %c0_i32, %c0_i32_0 : i32, i32
  }
  func.func @transform_2(%arg0: i32) -> (i32, i32) {
    %c0_i32 = arith.constant 0 : i32
    %c0_i32_0 = arith.constant 0 : i32
    %c0_i32_1 = arith.constant 0 : i32
    return %c0_i32, %c0_i32_0 : i32, i32
  }
  func.func @transform_3(%arg0: i32) -> (i32, i32) {
    %c0_i32 = arith.constant 0 : i32
    %c0_i32_0 = arith.constant 0 : i32
    %c0_i32_1 = arith.constant 0 : i32
    return %c0_i32, %c0_i32_0 : i32, i32
  }
  func.func @transform_4(%arg0: i32) -> (i32, i32) {
    %c0_i32 = arith.constant 0 : i32
    %c0_i32_0 = arith.constant 0 : i32
    %c0_i32_1 = arith.constant 0 : i32
    return %c0_i32, %c0_i32_0 : i32, i32
  }
  func.func @transform_5(%arg0: i32) -> (i32, i32) {
    %c0_i32 = arith.constant 0 : i32
    %c0_i32_0 = arith.constant 0 : i32
    return %c0_i32, %arg0 : i32, i32
  }
}

</mosaic_0001>

<bundles_post_ra>
// kernel: tpu_custom_call.1
= control target key start
LH: loop header
LB: loop body
LE: loop exit
PB: predicated region body
PF: predicated region fallthrough
CT: control target
= control target key end

     0   :  { %11 = vsyncpa [#allocation4], 0  ;;  %s2123_s0 = inlined_call_operand.hbm [shape: bf16[128,896], index: 0, kind: input, shape index: {}]   ;;  %s2124_s1 = inlined_call_operand.hbm [shape: bf16[896,128], index: 1, kind: input, shape index: {}]   ;;  %s2125_s2 = inlined_call_operand.vmem [shape: f32[1,128], index: 2, kind: input, shape index: {}]   ;;  %s2126_s3 = inlined_call_operand.vmem [shape: f32[1,128], index: 3, kind: input, shape index: {}]   ;;  %s2127_s4 = inlined_call_operand.<no memory space> [shape: f32[1,1], index: 4, kind: input, shape index: {}]   ;;  %s2128_s5 = inlined_call_operand.hbm [shape: f32[1,128], index: 5, kind: output, shape index: {}]  }
   0x1   :  { %12 = vsyncpa [#allocation7], 0 }
   0x2   :  { %13 = vsyncpa [#allocation5], 0  ;;  %s18_s20 = sshll.u32 %s2123_s0, 4  ;;  %s1953_s21 = smov [#allocation3]   ;;  %s19_s20 = int_to_ptr.hbm [resolvable:$true] %s18_s20 }
   0x3   :  { %s20_s22 = sshll.u32 %s1953_s21, 4  ;;  %s31_s25 = sshll.u32 %s2124_s1, 4  ;;  %s21_s22 = int_to_ptr.vmem [resolvable:$true] %s20_s22  ;;  %s32_s25 = int_to_ptr.hbm [resolvable:$true] %s31_s25 }
   0x4   :  { %s1954_s26 = smov 448   ;;  %s1955_s27 = smov 28  }
   0x5   :  { %26 = dma.hbm_to_vmem [thread:$0]  %s19_s20, 7168, %s21_s22, [#allocation4], %s1954_s26, %s1954_s26, %s1955_s27  }
   0x6   :  { %s1956_s28 = smov [#allocation6]   ;;  %s1957_s30 = smov 64  }
   0x7   :  { %s33_s29 = sshll.u32 %s1956_s28, 4  ;;  %s1958_s6 = smov 4   ;;  %s34_s29 = int_to_ptr.vmem [resolvable:$true] %s33_s29 }
   0x8   :  { %39 = dma.hbm_to_vmem [thread:$0]  %s32_s25, 7168, %s34_s29, [#allocation7], %s1957_s30, %s1957_s30, %s1958_s6  }
   0x9   :  { %1947 = dma.done.wait [#allocation4], 7168  }
   0xa   :  { %1948 = vsyncadd [#allocation4], 4294960128 }
   0xb   :  { %1949 = dma.done.wait [#allocation7], 7168  }
   0xc   :  { %1950 = vsyncadd [#allocation7], 4294960128  ;;  %v1790_v0 = vld [vmem:[#allocation6 + $0x38] sm:$0xff]  ;;  %v1789_v3 = vld [vmem:[#allocation6 + $0x30] sm:$0xff] }
   0xd   :  { %v1798_v1 = vld [vmem:[#allocation6 + $0x78] sm:$0xff]  ;;  %858 = vmatpush.bf16.msra.mxu0 %v1790_v0  ;;  %1839 = vmatpush.bf16.msra.mxu3 %v1790_v0  ;;  %v1797_v4 = vld [vmem:[#allocation6 + $0x70] sm:$0xff]  ;;  %v1788_v6 = vld [vmem:[#allocation6 + $0x28] sm:$0xff] }
   0xe   :  { %v1806_v2 = vld [vmem:[#allocation6 + $0xb8] sm:$0xff]  ;;  %907 = vmatpush.bf16.msra.mxu1 %v1798_v1  ;;  %v1805_v5 = vld [vmem:[#allocation6 + $0xb0] sm:$0xff]  ;;  %v1796_v7 = vld [vmem:[#allocation6 + $0x68] sm:$0xff] }
   0xf   :  { %956 = vmatpush.bf16.msra.mxu2 %v1806_v2  ;;  %v1804_v8 = vld [vmem:[#allocation6 + $0xa8] sm:$0xff]  ;;  %v1787_v9 = vld [vmem:[#allocation6 + $0x20] sm:$0xff]  ;;  %v1786_v12 = vld [vmem:[#allocation6 + $0x18] sm:$0xff] }
  0x10   :  { %v1795_v10 = vld [vmem:[#allocation6 + $0x60] sm:$0xff]  ;;  %v1794_v13 = vld [vmem:[#allocation6 + $0x58] sm:$0xff]  ;;  %v1785_v15 = vld [vmem:[#allocation6 + $0x10] sm:$0xff] }
  0x11   :  { %859 = vmatpush.bf16.msra.mxu0 %v1789_v3  ;;  %1840 = vmatpush.bf16.msra.mxu3 %v1789_v3  ;;  %v1803_v11 = vld [vmem:[#allocation6 + $0xa0] sm:$0xff]  ;;  %v1802_v14 = vld [vmem:[#allocation6 + $0x98] sm:$0xff]  ;;  %v1793_v16 = vld [vmem:[#allocation6 + $0x50] sm:$0xff] }
  0x12   :  { %908 = vmatpush.bf16.msra.mxu1 %v1797_v4  ;;  %v1801_v17 = vld [vmem:[#allocation6 + $0x90] sm:$0xff]  ;;  %v1784_v18 = vld [vmem:[#allocation6 + $0x8] sm:$0xff]  ;;  %v1783_v21 = vld [vmem:[#allocation6] sm:$0xff] }
  0x13   :  { %957 = vmatpush.bf16.msra.mxu2 %v1805_v5  ;;  %v1792_v19 = vld [vmem:[#allocation6 + $0x48] sm:$0xff]  ;;  %v1791_v22 = vld [vmem:[#allocation6 + $0x40] sm:$0xff]  ;;  %v1730_v25 = vld [vmem:[#allocation3 + $0x18] sm:$0xf0] }
  0x14   :  { %v1800_v20 = vld [vmem:[#allocation6 + $0x88] sm:$0xff]  ;;  %v1799_v23 = vld [vmem:[#allocation6 + $0x80] sm:$0xff]  ;;  %v1336_v26 = vld [vmem:[#allocation3 + $0x70] sm:$0xf] }
  0x15   :  { %860 = vmatpush.bf16.msra.mxu0 %v1788_v6  ;;  %1841 = vmatpush.bf16.msra.mxu3 %v1788_v6  ;;  %v1280_v24 = vld [vmem:[#allocation3] sm:$0xf]  ;;  %v1744_v27 = vld [vmem:[#allocation3 + $0x88] sm:$0xf0]  ;;  %v1727_v28 = vld [vmem:[#allocation3 + $0x4] sm:$0xf] }
  0x16   :  { %909 = vmatpush.bf16.msra.mxu1 %v1796_v7  ;;  %v1282_v29 = vld [vmem:[#allocation3 + $0x1c] sm:$0xf0]  ;;  %v1288_v30 = vld [vmem:[#allocation3 + $0x8] sm:$0xf]  ;;  %v1731_v31 = vld [vmem:[#allocation3 + $0x20] sm:$0xf0]  ;;  %v1281_v33 = vor.u32 %v1730_v25, %v1280_v24  ;;  %v1337_v34 = vor.u32 %v1744_v27, %v1336_v26 }
  0x17   :  { %958 = vmatpush.bf16.msra.mxu2 %v1804_v8  ;;  %v1822_v32 = vld [vmem:[#allocation6 + $0x138] sm:$0xff]  ;;  %v1285_v35 = vor.u32 %v1727_v28, %v1282_v29  ;;  %v1289_v36 = vor.u32 %v1731_v31, %v1288_v30  ;;  %v1821_v37 = vld [vmem:[#allocation6 + $0x130] sm:$0xff]  ;;  %v1820_v38 = vld [vmem:[#allocation6 + $0x128] sm:$0xff] }
  0x18   :  { %v1819_v39 = vld [vmem:[#allocation6 + $0x120] sm:$0xff]  ;;  %v1308_v40 = vld [vmem:[#allocation3 + $0x38] sm:$0xf]  ;;  %v1737_v41 = vld [vmem:[#allocation3 + $0x50] sm:$0xf0] }
  0x19   :  { %861 = vmatpush.bf16.msra.mxu0 %v1787_v9  ;;  %1842 = vmatpush.bf16.msra.mxu3 %v1787_v9  ;;  %v1364_v42 = vld [vmem:[#allocation3 + $0xa8] sm:$0xf]  ;;  %v1751_v43 = vld [vmem:[#allocation3 + $0xc0] sm:$0xf0]  ;;  %v1734_v44 = vld [vmem:[#allocation3 + $0x3c] sm:$0xf]  ;;  %v1309_v49 = vor.u32 %v1737_v41, %v1308_v40 }
  0x1a   :  { %910 = vmatpush.bf16.msra.mxu1 %v1795_v10  ;;  %v1310_v45 = vld [vmem:[#allocation3 + $0x54] sm:$0xf0]  ;;  %v1316_v46 = vld [vmem:[#allocation3 + $0x40] sm:$0xf]  ;;  %v1738_v47 = vld [vmem:[#allocation3 + $0x58] sm:$0xf0]  ;;  %v1365_v50 = vor.u32 %v1751_v43, %v1364_v42 }
  0x1b   :  { %959 = vmatpush.bf16.msra.mxu2 %v1803_v11  ;;  %v1818_v48 = vld [vmem:[#allocation6 + $0x118] sm:$0xff]  ;;  %v1313_v51 = vor.u32 %v1734_v44, %v1310_v45  ;;  %v1317_v52 = vor.u32 %v1738_v47, %v1316_v46  ;;  %v1817_v53 = vld [vmem:[#allocation6 + $0x110] sm:$0xff]  ;;  %v1816_v54 = vld [vmem:[#allocation6 + $0x108] sm:$0xff] }
  0x1c   :  { %v1815_v55 = vld [vmem:[#allocation6 + $0x100] sm:$0xff]  ;;  %v1758_v57 = vld [vmem:[#allocation3 + $0xf8] sm:$0xf0]  ;;  %v1741_v58 = vld [vmem:[#allocation3 + $0x74] sm:$0xf] }
  0x1d   :  { %862 = vmatpush.bf16.msra.mxu0 %v1786_v12  ;;  %1843 = vmatpush.bf16.msra.mxu3 %v1786_v12  ;;  %v1392_v56 = vld [vmem:[#allocation3 + $0xe0] sm:$0xf]  ;;  %v1296_v59 = vld [vmem:[#allocation3 + $0x10] sm:$0xf]  ;;  %v1732_v60 = vld [vmem:[#allocation3 + $0x28] sm:$0xf0] }
  0x1e   :  { %911 = vmatpush.bf16.msra.mxu1 %v1794_v13  ;;  %v1338_v61 = vld [vmem:[#allocation3 + $0x8c] sm:$0xf0]  ;;  %v1344_v62 = vld [vmem:[#allocation3 + $0x78] sm:$0xf]  ;;  %v1745_v63 = vld [vmem:[#allocation3 + $0x90] sm:$0xf0]  ;;  %v1393_v0 = vor.u32 %v1758_v57, %v1392_v56  ;;  %v1297_v1 = vor.u32 %v1732_v60, %v1296_v59 }
  0x1f   :  { %960 = vmatpush.bf16.msra.mxu2 %v1802_v14  ;;  %v1341_v2 = vor.u32 %v1741_v58, %v1338_v61  ;;  %v1345_v3 = vor.u32 %v1745_v63, %v1344_v62  ;;  %v1814_v4 = vld [vmem:[#allocation6 + $0xf8] sm:$0xff]  ;;  %v1813_v7 = vld [vmem:[#allocation6 + $0xf0] sm:$0xff]  ;;  %v1812_v8 = vld [vmem:[#allocation6 + $0xe8] sm:$0xff] }
  0x20   :  { %v1996_v5 = vld [vmem:[#allocation6 + $0x1b8] sm:$0xff]  ;;  %v1765_v10 = vld [vmem:[#allocation3 + $0x130] sm:$0xf0]  ;;  %v1748_v11 = vld [vmem:[#allocation3 + $0xac] sm:$0xf] }
  0x21   :  { %863 = vmatpush.bf16.msra.mxu0 %v1785_v15  ;;  %1844 = vmatpush.bf16.msra.mxu3 %v1785_v15  ;;  %v1830_v6 = vld [vmem:[#allocation6 + $0x178] sm:$0xff]  ;;  %v1366_v12 = vld [vmem:[#allocation3 + $0xc4] sm:$0xf0]  ;;  %v1739_v14 = vld [vmem:[#allocation3 + $0x60] sm:$0xf0] }
  0x22   :  { %912 = vmatpush.bf16.msra.mxu1 %v1793_v16  ;;  %v1420_v9 = vld [vmem:[#allocation3 + $0x118] sm:$0xf]  ;;  %v1324_v13 = vld [vmem:[#allocation3 + $0x48] sm:$0xf]  ;;  %v1372_v15 = vld [vmem:[#allocation3 + $0xb0] sm:$0xf] }
  0x23   :  { %961 = vmatpush.bf16.msra.mxu2 %v1801_v17  ;;  %v1752_v16 = vld [vmem:[#allocation3 + $0xc8] sm:$0xf0]  ;;  %v1811_v17 = vld [vmem:[#allocation6 + $0xe0] sm:$0xff]  ;;  %v1829_v24 = vld [vmem:[#allocation6 + $0x170] sm:$0xff] }
  0x24   :  { %v1809_v25 = vld [vmem:[#allocation6 + $0xd0] sm:$0xff]  ;;  %v1808_v26 = vld [vmem:[#allocation6 + $0xc8] sm:$0xff]  ;;  %v1755_v29 = vld [vmem:[#allocation3 + $0xe4] sm:$0xf] }
  0x25   :  { %864 = vmatpush.bf16.msra.mxu0 %v1784_v18  ;;  %1845 = vmatpush.bf16.msra.mxu3 %v1784_v18  ;;  %v1421_v18 = vor.u32 %v1765_v10, %v1420_v9  ;;  %v1448_v27 = vld [vmem:[#allocation3 + $0x150] sm:$0xf]  ;;  %v1772_v28 = vld [vmem:[#allocation3 + $0x168] sm:$0xf0]  ;;  %v1394_v30 = vld [vmem:[#allocation3 + $0xfc] sm:$0xf0] }
  0x26   :  { %913 = vmatpush.bf16.msra.mxu1 %v1792_v19  ;;  %v1325_v19 = vor.u32 %v1739_v14, %v1324_v13  ;;  %v1352_v31 = vld [vmem:[#allocation3 + $0x80] sm:$0xf]  ;;  %v2002_v40 = vld [vmem:[#allocation6 + $0x1a8] sm:$0xff]  ;;  %v1779_v45 = vld [vmem:[#allocation3 + $0x1a0] sm:$0xf0] }
  0x27   :  { %962 = vmatpush.bf16.msra.mxu2 %v1800_v20  ;;  %v1369_v20 = vor.u32 %v1748_v11, %v1366_v12  ;;  %v1828_v41 = vld [vmem:[#allocation6 + $0x168] sm:$0xff]  ;;  %v1827_v42 = vld [vmem:[#allocation6 + $0x160] sm:$0xff]  ;;  %v1762_v46 = vld [vmem:[#allocation3 + $0x11c] sm:$0xf] }
  0x28   :  { %v2005_v43 = vld [vmem:[#allocation6 + $0x1a0] sm:$0xff]  ;;  %v1476_v44 = vld [vmem:[#allocation3 + $0x188] sm:$0xf]  ;;  %v1380_v47 = vld [vmem:[#allocation3 + $0xb8] sm:$0xf] }
  0x29   :  { %865 = vmatpush.bf16.msra.mxu0 %v1783_v21  ;;  %1846 = vmatpush.bf16.msra.mxu3 %v1783_v21  ;;  %v1373_v21 = vor.u32 %v1752_v16, %v1372_v15  ;;  %v1826_v56 = vld [vmem:[#allocation6 + $0x158] sm:$0xff]  ;;  %v1825_v58 = vld [vmem:[#allocation6 + $0x150] sm:$0xff]  ;;  %v1824_v60 = vld [vmem:[#allocation6 + $0x148] sm:$0xff] }
  0x2a   :  { %914 = vmatpush.bf16.msra.mxu1 %v1791_v22  ;;  %v1810_v22 = vld [vmem:[#allocation6 + $0xd8] sm:$0xff]  ;;  %v1833_v59 = vld [vmem:[#allocation6 + $0x190] sm:$0xff]  ;;  %v1832_v61 = vld [vmem:[#allocation6 + $0x188] sm:$0xff] }
  0x2b   :  { %963 = vmatpush.bf16.msra.mxu2 %v1799_v23  ;;  %v1999_v23 = vld [vmem:[#allocation6 + $0x1b0] sm:$0xff]  ;;  %v1834_v57 = vld [vmem:[#allocation6 + $0x198] sm:$0xff]  ;;  %v1728_v63 = vld [vmem:[#allocation3 + $0xc] sm:$0xf] }
  0x2c   :  { %866 = vmatmul.bf16.vlgmr.msra.gmra.mxu0 %v1281_v33  ;;  %876 = vmatmul.bf16.vlgmr.msra.gmra.mxu3 %v1337_v34  ;;  %v1400_v33 = vld [vmem:[#allocation3 + $0xe8] sm:$0xf]  ;;  %v1759_v34 = vld [vmem:[#allocation3 + $0x100] sm:$0xf0]  ;;  %v1769_v62 = vld [vmem:[#allocation3 + $0x154] sm:$0xf] }
  0x2d   :  { %1054 = vmatpush.bf16.msrb.mxu0 %v1822_v32  ;;  %915 = vmatmul.bf16.vlgmr.msra.gmra.mxu1 %v1285_v35  ;;  %v1746_v32 = vld [vmem:[#allocation3 + $0x98] sm:$0xf0]  ;;  %v1807_v35 = vld [vmem:[#allocation6 + $0xc0] sm:$0xff]  ;;  %v1776_v13 = vld [vmem:[#allocation3 + $0x18c] sm:$0xf] }
  0x2e   :  { %964 = vmatmul.bf16.vlgmr.msra.gmra.mxu2 %v1289_v36  ;;  %1005 = vmatpush.bf16.msrb.mxu3 %v1814_v4  ;;  %v1449_v36 = vor.u32 %v1772_v28, %v1448_v27  ;;  %v1456_v4 = vld [vmem:[#allocation3 + $0x158] sm:$0xf]  ;;  %v1823_v9 = vld [vmem:[#allocation6 + $0x140] sm:$0xff]  ;;  %v1436_v16 = vld [vmem:[#allocation3 + $0x128] sm:$0xf] }
  0x2f   :  { %1855 = vmatpush.bf16.msrb.mxu2 %v1996_v5  ;;  %1847 = vmatpush.bf16.msrb.mxu1 %v1830_v6  ;;  %v1831_v10 = vld [vmem:[#allocation6 + $0x180] sm:$0xff]  ;;  %v1774_v28 = vld [vmem:[#allocation3 + $0x178] sm:$0xf0] }
  0x30   :  { %v1735_v14 = vld [vmem:[#allocation3 + $0x44] sm:$0xf]  ;;  %v1318_v15 = vld [vmem:[#allocation3 + $0x5c] sm:$0xf0] }
  0x31   :  { %1055 = vmatpush.bf16.msrb.mxu0 %v1821_v37  ;;  %v1353_v37 = vor.u32 %v1746_v32, %v1352_v31  ;;  %v1464_v27 = vld [vmem:[#allocation3 + $0x160] sm:$0xf]  ;;  %v1332_v31 = vld [vmem:[#allocation3 + $0x50] sm:$0xf]  ;;  %v1740_v32 = vld [vmem:[#allocation3 + $0x68] sm:$0xf0] }
  0x32   :  { %1006 = vmatpush.bf16.msrb.mxu3 %v1813_v7 }
  0x33   :  { %1856 = vmatpush.bf16.msrb.mxu2 %v1999_v23  ;;  %1848 = vmatpush.bf16.msrb.mxu1 %v1829_v24 }
  0x35   :  { %1056 = vmatpush.bf16.msrb.mxu0 %v1820_v38  ;;  %v1397_v38 = vor.u32 %v1755_v29, %v1394_v30  ;;  %v1736_v29 = vld [vmem:[#allocation3 + $0x4c] sm:$0xf]  ;;  %v1326_v30 = vld [vmem:[#allocation3 + $0x64] sm:$0xf0] }
  0x36   :  { %1007 = vmatpush.bf16.msrb.mxu3 %v1812_v8 }
  0x37   :  { %1857 = vmatpush.bf16.msrb.mxu2 %v2002_v40  ;;  %1849 = vmatpush.bf16.msrb.mxu1 %v1828_v41 }
  0x39   :  { %1057 = vmatpush.bf16.msrb.mxu0 %v1819_v39  ;;  %v1401_v39 = vor.u32 %v1759_v34, %v1400_v33  ;;  %v1465_v34 = vor.u32 %v1774_v28, %v1464_v27 }
  0x3a   :  { %1008 = vmatpush.bf16.msrb.mxu3 %v1811_v17  ;;  %v1767_v17 = vld [vmem:[#allocation3 + $0x140] sm:$0xf0] }
  0x3b   :  { %1850 = vmatpush.bf16.msrb.mxu1 %v1827_v42  ;;  %1858 = vmatpush.bf16.msrb.mxu2 %v2005_v43 }
  0x3c   :  { %871 = vmatmul.bf16.gmra.mxu0 %v1309_v49  ;;  %881 = vmatmul.bf16.gmra.mxu3 %v1365_v50  ;;  %v1422_v49 = vld [vmem:[#allocation3 + $0x134] sm:$0xf0]  ;;  %v1428_v50 = vld [vmem:[#allocation3 + $0x120] sm:$0xf] }
  0x3d   :  { %1058 = vmatpush.bf16.msrb.mxu0 %v1818_v48  ;;  %920 = vmatmul.bf16.gmra.mxu1 %v1313_v51  ;;  %v1753_v48 = vld [vmem:[#allocation3 + $0xd0] sm:$0xf0]  ;;  %v1766_v51 = vld [vmem:[#allocation3 + $0x138] sm:$0xf0] }
  0x3e   :  { %969 = vmatmul.bf16.gmra.mxu2 %v1317_v52  ;;  %1009 = vmatpush.bf16.msrb.mxu3 %v1810_v22  ;;  %v1477_v52 = vor.u32 %v1779_v45, %v1476_v44  ;;  %v1437_v22 = vor.u32 %v1767_v17, %v1436_v16  ;;  %v1382_v16 = vld [vmem:[#allocation3 + $0xd4] sm:$0xf0]  ;;  %v1388_v17 = vld [vmem:[#allocation3 + $0xc0] sm:$0xf] }
  0x3f   :  { %1851 = vmatpush.bf16.msrb.mxu1 %v1826_v56  ;;  %1859 = vmatpush.bf16.msrb.mxu2 %v1834_v57 }
  0x41   :  { %1059 = vmatpush.bf16.msrb.mxu0 %v1817_v53  ;;  %v1381_v53 = vor.u32 %v1753_v48, %v1380_v47  ;;  %v1749_v48 = vld [vmem:[#allocation3 + $0xb4] sm:$0xf] }
  0x42   :  { %1010 = vmatpush.bf16.msrb.mxu3 %v1809_v25 }
  0x43   :  { %1852 = vmatpush.bf16.msrb.mxu1 %v1825_v58  ;;  %1860 = vmatpush.bf16.msrb.mxu2 %v1833_v59 }
  0x45   :  { %1060 = vmatpush.bf16.msrb.mxu0 %v1816_v54  ;;  %v1425_v54 = vor.u32 %v1762_v46, %v1422_v49  ;;  %v1374_v49 = vld [vmem:[#allocation3 + $0xcc] sm:$0xf0] }
  0x46   :  { %1011 = vmatpush.bf16.msrb.mxu3 %v1808_v26  ;;  %v1346_v26 = vld [vmem:[#allocation3 + $0x94] sm:$0xf0] }
  0x47   :  { %1853 = vmatpush.bf16.msrb.mxu1 %v1824_v60  ;;  %1861 = vmatpush.bf16.msrb.mxu2 %v1832_v61 }
  0x49   :  { %1061 = vmatpush.bf16.msrb.mxu0 %v1815_v55  ;;  %v1429_v55 = vor.u32 %v1766_v51, %v1428_v50  ;;  %v1492_v50 = vld [vmem:[#allocation3 + $0x198] sm:$0xf]  ;;  %v1781_v51 = vld [vmem:[#allocation3 + $0x1b0] sm:$0xf0] }
  0x4a   :  { %1012 = vmatpush.bf16.msrb.mxu3 %v1807_v35 }
  0x4b   :  { %1854 = vmatpush.bf16.msrb.mxu1 %v1823_v9  ;;  %1862 = vmatpush.bf16.msrb.mxu2 %v1831_v10 }
  0x4c   :  { %886 = vmatmul.bf16.gmra.mxu3 %v1393_v0  ;;  %1062 = vmatmul.bf16.vlgmr.msrb.gmra.mxu0 %v1297_v1  ;;  %v1290_v0 = vld [vmem:[#allocation3 + $0x24] sm:$0xf0]  ;;  %v1408_v1 = vld [vmem:[#allocation3 + $0xf0] sm:$0xf] }
  0x4d   :  { %925 = vmatmul.bf16.gmra.mxu1 %v1341_v2  ;;  %1103 = vmatpush.bf16.msra.mxu0 %v1830_v6  ;;  %v1760_v2 = vld [vmem:[#allocation3 + $0x108] sm:$0xf0]  ;;  %v1773_v6 = vld [vmem:[#allocation3 + $0x170] sm:$0xf0]  ;;  %v1293_v7 = vor.u32 %v1728_v63, %v1290_v0 }
  0x4e   :  { %974 = vmatmul.bf16.gmra.mxu2 %v1345_v3  ;;  %v1450_v3 = vld [vmem:[#allocation3 + $0x16c] sm:$0xf0]  ;;  %v1409_v8 = vor.u32 %v1760_v2, %v1408_v1  ;;  %v1457_v12 = vor.u32 %v1773_v6, %v1456_v4 }
  0x4f   :  { %v1453_v11 = vor.u32 %v1769_v62, %v1450_v3 }
  0x51   :  { %1104 = vmatpush.bf16.msra.mxu0 %v1829_v24 }
  0x55   :  { %1105 = vmatpush.bf16.msra.mxu0 %v1828_v41 }
  0x59   :  { %1106 = vmatpush.bf16.msra.mxu0 %v1827_v42 }
  0x5c   :  { %891 = vmatmul.bf16.gmra.mxu3 %v1421_v18  ;;  %1067 = vmatmul.bf16.gmra.mxu0 %v1325_v19  ;;  %v1478_v18 = vld [vmem:[#allocation3 + $0x1a4] sm:$0xf0]  ;;  %v1484_v19 = vld [vmem:[#allocation3 + $0x190] sm:$0xf] }
  0x5d   :  { %930 = vmatmul.bf16.gmra.mxu1 %v1369_v20  ;;  %1107 = vmatpush.bf16.msra.mxu0 %v1826_v56  ;;  %v1780_v20 = vld [vmem:[#allocation3 + $0x1a8] sm:$0xf0]  ;;  %v1481_v24 = vor.u32 %v1776_v13, %v1478_v18  ;;  %v1729_v13 = vld [vmem:[#allocation3 + $0x14] sm:$0xf]  ;;  %v1754_v18 = vld [vmem:[#allocation3 + $0xd8] sm:$0xf0] }
  0x5e   :  { %979 = vmatmul.bf16.gmra.mxu2 %v1373_v21  ;;  %v1321_v21 = vor.u32 %v1735_v14, %v1318_v15  ;;  %v1485_v25 = vor.u32 %v1780_v20, %v1484_v19  ;;  %v1298_v14 = vld [vmem:[#allocation3 + $0x2c] sm:$0xf0]  ;;  %v1750_v15 = vld [vmem:[#allocation3 + $0xbc] sm:$0xf] }
  0x61   :  { %1108 = vmatpush.bf16.msra.mxu0 %v1825_v58  ;;  %v1377_v58 = vor.u32 %v1749_v48, %v1374_v49 }
  0x65   :  { %1109 = vmatpush.bf16.msra.mxu0 %v1824_v60 }
  0x69   :  { %1110 = vmatpush.bf16.msra.mxu0 %v1823_v9 }
  0x6c   :  { %896 = vmatmul.bf16.gmra.mxu3 %v1449_v36  ;;  %1072 = vmatmul.bf16.gmra.mxu0 %v1353_v37  ;;  %v1329_v36 = vor.u32 %v1736_v29, %v1326_v30  ;;  %v1333_v37 = vor.u32 %v1740_v32, %v1332_v31 }
  0x6d   :  { %935 = vmatmul.bf16.gmra.mxu1 %v1397_v38  ;;  %1152 = vmatpush.bf16.msrb.mxu0 %v1996_v5  ;;  %v2015_v5 = vld [vmem:[%s2125_s2] ss:$0 sm:$0xff] }
  0x6e   :  { %984 = vmatmul.bf16.gmra.mxu2 %v1401_v39 }
  0x71   :  { %1153 = vmatpush.bf16.msrb.mxu0 %v1999_v23  ;;  %v1742_v23 = vld [vmem:[#allocation3 + $0x7c] sm:$0xf] }
  0x72   :  { %v1349_v33 = vor.u32 %v1742_v23, %v1346_v26  ;;  %v1385_v23 = vor.u32 %v1750_v15, %v1382_v16  ;;  %v1389_v26 = vor.u32 %v1754_v18, %v1388_v17 }
  0x75   :  { %1154 = vmatpush.bf16.msrb.mxu0 %v2002_v40 }
  0x79   :  { %1155 = vmatpush.bf16.msrb.mxu0 %v2005_v43 }
  0x7c   :  { %901 = vmatmul.bf16.gmra.mxu3 %v1477_v52  ;;  %1077 = vmatmul.bf16.gmra.mxu0 %v1381_v53  ;;  %v1743_v52 = vld [vmem:[#allocation3 + $0x84] sm:$0xf]  ;;  %v1354_v53 = vld [vmem:[#allocation3 + $0x9c] sm:$0xf0] }
  0x7d   :  { %940 = vmatmul.bf16.gmra.mxu1 %v1425_v54  ;;  %1156 = vmatpush.bf16.msrb.mxu0 %v1834_v57  ;;  %v1360_v54 = vld [vmem:[#allocation3 + $0x88] sm:$0xf]  ;;  %v1357_v62 = vor.u32 %v1743_v52, %v1354_v53 }
  0x7e   :  { %989 = vmatmul.bf16.gmra.mxu2 %v1429_v55  ;;  %v1747_v55 = vld [vmem:[#allocation3 + $0xa0] sm:$0xf0] }
  0x7f   :  { %v1361_v63 = vor.u32 %v1747_v55, %v1360_v54 }
  0x81   :  { %1157 = vmatpush.bf16.msrb.mxu0 %v1833_v59  ;;  %v1493_v59 = vor.u32 %v1781_v51, %v1492_v50 }
  0x85   :  { %1158 = vmatpush.bf16.msrb.mxu0 %v1832_v61 }
  0x89   :  { %1159 = vmatpush.bf16.msrb.mxu0 %v1831_v10 }
  0x8c   :  { %1013 = vmatmul.bf16.vlgmr.msrb.gmra.mxu3 %v1293_v7  ;;  %1082 = vmatmul.bf16.gmra.mxu0 %v1409_v8 }
  0x8d   :  { %945 = vmatmul.bf16.gmra.mxu1 %v1453_v11  ;;  %v1756_v11 = vld [vmem:[#allocation3 + $0xec] sm:$0xf] }
  0x8e   :  { %994 = vmatmul.bf16.gmra.mxu2 %v1457_v12  ;;  %v1402_v12 = vld [vmem:[#allocation3 + $0x104] sm:$0xf0] }
  0x9c   :  { %1018 = vmatmul.bf16.gmra.mxu3 %v1321_v21  ;;  %1087 = vmatmul.bf16.gmra.mxu0 %v1437_v22  ;;  %v1405_v21 = vor.u32 %v1756_v11, %v1402_v12  ;;  %v1301_v22 = vor.u32 %v1729_v13, %v1298_v14 }
  0x9d   :  { %950 = vmatmul.bf16.gmra.mxu1 %v1481_v24 }
  0x9e   :  { %999 = vmatmul.bf16.gmra.mxu2 %v1485_v25 }
  0xa9   :  { %v867_v35 = vpop.f32.mrf.mxu0 }
  0xaa   :  { %v868_v38 = vadd.f32 %v2015_v5, %v867_v35  ;;  %v916_v39 = vpop.f32.mrf.mxu1  ;;  %v1763_v35 = vld [vmem:[#allocation3 + $0x124] sm:$0xf] }
  0xac   :  { %v917_v40 = vadd.f32 %v916_v39, %v868_v38  ;;  %1023 = vmatmul.bf16.gmra.mxu3 %v1349_v33  ;;  %1092 = vmatmul.bf16.gmra.mxu0 %v1465_v34  ;;  %v1304_v38 = vld [vmem:[#allocation3 + $0x18] sm:$0xf]  ;;  %v1733_v39 = vld [vmem:[#allocation3 + $0x30] sm:$0xf0] }
  0xad   :  { %1116 = vmatmul.bf16.vlgmr.msrb.gmra.mxu1 %v1329_v36  ;;  %v1430_v36 = vld [vmem:[#allocation3 + $0x13c] sm:$0xf0] }
  0xae   :  { %1165 = vmatmul.bf16.vlgmr.msrb.gmra.mxu2 %v1333_v37  ;;  %v1757_v37 = vld [vmem:[#allocation3 + $0xf4] sm:$0xf] }
  0xaf   :  { %v877_v41 = vpop.f32.mrf.mxu3 }
  0xb0   :  { %v878_v24 = vadd.f32 %v2015_v5, %v877_v41  ;;  %v1416_v41 = vld [vmem:[#allocation3 + $0xf8] sm:$0xf] }
  0xb1   :  { %v965_v42 = vpop.f32.mrf.mxu2  ;;  %v869_v44 = vpop.f32.mrf.mxu0 }
  0xb2   :  { %v2018_v43 = vadd.f32 %v965_v42, %v917_v40  ;;  %v870_v45 = vadd.f32 %v2015_v5, %v869_v44  ;;  %v918_v46 = vpop.f32.mrf.mxu1  ;;  %v1410_v40 = vld [vmem:[#allocation3 + $0x10c] sm:$0xf0]  ;;  %v1761_v42 = vld [vmem:[#allocation3 + $0x110] sm:$0xf0] }
  0xb3   :  { %v1413_v50 = vor.u32 %v1757_v37, %v1410_v40  ;;  %v1417_v51 = vor.u32 %v1761_v42, %v1416_v41 }
  0xb4   :  { %v919_v47 = vadd.f32 %v918_v46, %v870_v45  ;;  %v1433_v46 = vor.u32 %v1763_v35, %v1430_v36 }
  0xb7   :  { %v879_v56 = vpop.f32.mrf.mxu3 }
  0xb8   :  { %v880_v31 = vadd.f32 %v2015_v5, %v879_v56 }
  0xb9   :  { %v967_v57 = vpop.f32.mrf.mxu2  ;;  %v872_v61 = vpop.f32.mrf.mxu0 }
  0xba   :  { %v2021_v60 = vadd.f32 %v967_v57, %v919_v47  ;;  %v873_v0 = vadd.f32 %v2015_v5, %v872_v61  ;;  %v921_v1 = vpop.f32.mrf.mxu1  ;;  %v1305_v47 = vor.u32 %v1733_v39, %v1304_v38  ;;  %v1770_v61 = vld [vmem:[#allocation3 + $0x15c] sm:$0xf] }
  0xbc   :  { %v922_v2 = vadd.f32 %v921_v1, %v873_v0  ;;  %1028 = vmatmul.bf16.gmra.mxu3 %v1377_v58  ;;  %1097 = vmatmul.bf16.gmra.mxu0 %v1493_v59  ;;  %v1438_v0 = vld [vmem:[#allocation3 + $0x144] sm:$0xf0]  ;;  %v1444_v1 = vld [vmem:[#allocation3 + $0x130] sm:$0xf] }
  0xbd   :  { %1121 = vmatmul.bf16.gmra.mxu1 %v1357_v62  ;;  %v1458_v62 = vld [vmem:[#allocation3 + $0x174] sm:$0xf0] }
  0xbe   :  { %1170 = vmatmul.bf16.gmra.mxu2 %v1361_v63  ;;  %v1764_v63 = vld [vmem:[#allocation3 + $0x12c] sm:$0xf] }
  0xbf   :  { %v882_v3 = vpop.f32.mrf.mxu3 }
  0xc0   :  { %v883_v48 = vadd.f32 %v2015_v5, %v882_v3 }
  0xc1   :  { %v970_v4 = vpop.f32.mrf.mxu2  ;;  %v874_v7 = vpop.f32.mrf.mxu0 }
  0xc2   :  { %v2024_v6 = vadd.f32 %v970_v4, %v922_v2  ;;  %v875_v8 = vadd.f32 %v2015_v5, %v874_v7  ;;  %v923_v9 = vpop.f32.mrf.mxu1  ;;  %v1768_v2 = vld [vmem:[#allocation3 + $0x148] sm:$0xf0]  ;;  %v1461_v7 = vor.u32 %v1770_v61, %v1458_v62 }
  0xc4   :  { %v924_v10 = vadd.f32 %v923_v9, %v875_v8  ;;  %v1441_v9 = vor.u32 %v1764_v63, %v1438_v0 }
  0xc7   :  { %v884_v19 = vpop.f32.mrf.mxu3 }
  0xc8   :  { %v885_v56 = vadd.f32 %v2015_v5, %v884_v19 }
  0xc9   :  { %v972_v20 = vpop.f32.mrf.mxu2  ;;  %v2048_v37 = vpop.f32.mrf.mxu0 }
  0xca   :  { %v2028_v25 = vadd.f32 %v972_v20, %v924_v10  ;;  %v926_v27 = vpop.f32.mrf.mxu1  ;;  %v1445_v10 = vor.u32 %v1768_v2, %v1444_v1  ;;  %v1777_v20 = vld [vmem:[#allocation3 + $0x194] sm:$0xf] }
  0xcb   :  { %v927_v28 = vadd.f32 %v926_v27, %v878_v24  ;;  %v1466_v24 = vld [vmem:[#allocation3 + $0x17c] sm:$0xf0] }
  0xcc   :  { %1033 = vmatmul.bf16.gmra.mxu3 %v1405_v21  ;;  %1111 = vmatmul.bf16.vlgmr.msra.gmra.mxu0 %v1301_v22  ;;  %v1486_v21 = vld [vmem:[#allocation3 + $0x1ac] sm:$0xf0]  ;;  %v1771_v22 = vld [vmem:[#allocation3 + $0x164] sm:$0xf] }
  0xcd   :  { %1126 = vmatmul.bf16.gmra.mxu1 %v1385_v23  ;;  %v1472_v23 = vld [vmem:[#allocation3 + $0x168] sm:$0xf] }
  0xce   :  { %1175 = vmatmul.bf16.gmra.mxu2 %v1389_v26  ;;  %v1775_v26 = vld [vmem:[#allocation3 + $0x180] sm:$0xf0] }
  0xcf   :  { %v887_v29 = vpop.f32.mrf.mxu3 }
  0xd0   :  { %v888_v12 = vadd.f32 %v2015_v5, %v887_v29  ;;  %v1489_v29 = vor.u32 %v1777_v20, %v1486_v21 }
  0xd1   :  { %v975_v30 = vpop.f32.mrf.mxu2 }
  0xd2   :  { %v2031_v32 = vadd.f32 %v975_v30, %v927_v28  ;;  %v928_v33 = vpop.f32.mrf.mxu1 }
  0xd3   :  { %v929_v34 = vadd.f32 %v928_v33, %v880_v31  ;;  %v1469_v33 = vor.u32 %v1771_v22, %v1466_v24 }
  0xd7   :  { %v889_v44 = vpop.f32.mrf.mxu3 }
  0xd8   :  { %v890_v16 = vadd.f32 %v2015_v5, %v889_v44 }
  0xd9   :  { %v977_v45 = vpop.f32.mrf.mxu2 }
  0xda   :  { %v2034_v49 = vadd.f32 %v977_v45, %v929_v34  ;;  %v931_v52 = vpop.f32.mrf.mxu1  ;;  %v1473_v34 = vor.u32 %v1775_v26, %v1472_v23  ;;  %v1778_v45 = vld [vmem:[#allocation3 + $0x19c] sm:$0xf] }
  0xdb   :  { %v932_v53 = vadd.f32 %v931_v52, %v883_v48  ;;  %v1782_v48 = vld [vmem:[#allocation3 + $0x1b8] sm:$0xf0] }
  0xdc   :  { %1038 = vmatmul.bf16.gmra.mxu3 %v1433_v46  ;;  %1160 = vmatmul.bf16.vlgmr.msrb.gmra.mxu0 %v1305_v47  ;;  %v1494_v46 = vld [vmem:[#allocation3 + $0x1b4] sm:$0xf0]  ;;  %v1500_v47 = vld [vmem:[#allocation3 + $0x1a0] sm:$0xf] }
  0xdd   :  { %1131 = vmatmul.bf16.gmra.mxu1 %v1413_v50 }
  0xde   :  { %1180 = vmatmul.bf16.gmra.mxu2 %v1417_v51  ;;  %v2053_v51 = vpop.f32.mrf.mxu0 }
  0xdf   :  { %v892_v54 = vpop.f32.mrf.mxu3 }
  0xe0   :  { %v893_v30 = vadd.f32 %v2015_v5, %v892_v54 }
  0xe1   :  { %v980_v55 = vpop.f32.mrf.mxu2 }
  0xe2   :  { %v2037_v57 = vadd.f32 %v980_v55, %v932_v53  ;;  %v933_v58 = vpop.f32.mrf.mxu1  ;;  %v1497_v55 = vor.u32 %v1778_v45, %v1494_v46 }
  0xe3   :  { %v934_v59 = vadd.f32 %v933_v58, %v885_v56  ;;  %v1501_v56 = vor.u32 %v1782_v48, %v1500_v47 }
  0xe6   :  { %v1068_v2 = vpop.f32.mrf.mxu0 }
  0xe7   :  { %v894_v3 = vpop.f32.mrf.mxu3 }
  0xe8   :  { %v895_v40 = vadd.f32 %v2015_v5, %v894_v3 }
  0xe9   :  { %v982_v4 = vpop.f32.mrf.mxu2 }
  0xea   :  { %v2039_v8 = vadd.f32 %v982_v4, %v934_v59  ;;  %v936_v11 = vpop.f32.mrf.mxu1 }
  0xeb   :  { %v937_v13 = vadd.f32 %v936_v11, %v888_v12 }
  0xec   :  { %1043 = vmatmul.bf16.gmra.mxu3 %v1461_v7 }
  0xed   :  { %1136 = vmatmul.bf16.gmra.mxu1 %v1441_v9 }
  0xee   :  { %1185 = vmatmul.bf16.gmra.mxu2 %v1445_v10 }
  0xef   :  { %v897_v14 = vpop.f32.mrf.mxu3 }
  0xf0   :  { %v898_v53 = vadd.f32 %v2015_v5, %v897_v14 }
  0xf1   :  { %v985_v15 = vpop.f32.mrf.mxu2 }
  0xf2   :  { %v2043_v17 = vadd.f32 %v985_v15, %v937_v13  ;;  %v938_v18 = vpop.f32.mrf.mxu1 }
  0xf3   :  { %v939_v19 = vadd.f32 %v938_v18, %v890_v16 }
  0xf7   :  { %v899_v27 = vpop.f32.mrf.mxu3 }
  0xf8   :  { %v900_v0 = vadd.f32 %v2015_v5, %v899_v27 }
  0xf9   :  { %v987_v28 = vpop.f32.mrf.mxu2 }
  0xfa   :  { %v2046_v31 = vadd.f32 %v987_v28, %v939_v19  ;;  %v941_v35 = vpop.f32.mrf.mxu1 }
  0xfb   :  { %v942_v36 = vadd.f32 %v941_v35, %v893_v30 }
  0xfc   :  { %1048 = vmatmul.bf16.gmra.mxu3 %v1489_v29 }
  0xfd   :  { %1141 = vmatmul.bf16.gmra.mxu1 %v1469_v33 }
  0xfe   :  { %1190 = vmatmul.bf16.gmra.mxu2 %v1473_v34 }
  0xff   :  { %v902_v38 = vpop.f32.mrf.mxu3 }
 0x100   :  { %v903_v11 = vadd.f32 %v2015_v5, %v902_v38 }
 0x101   :  { %v990_v39 = vpop.f32.mrf.mxu2 }
 0x102   :  { %v2051_v41 = vadd.f32 %v990_v39, %v942_v36  ;;  %v943_v42 = vpop.f32.mrf.mxu1 }
 0x103   :  { %v944_v44 = vadd.f32 %v943_v42, %v895_v40 }
 0x107   :  { %v904_v50 = vpop.f32.mrf.mxu3 }
 0x108   :  { %v905_v19 = vadd.f32 %v2015_v5, %v904_v50 }
 0x109   :  { %v992_v52 = vpop.f32.mrf.mxu2 }
 0x10a   :  { %v2056_v54 = vadd.f32 %v992_v52, %v944_v44  ;;  %v946_v58 = vpop.f32.mrf.mxu1 }
 0x10b   :  { %v947_v59 = vadd.f32 %v946_v58, %v898_v53 }
 0x10d   :  { %1146 = vmatmul.bf16.gmra.mxu1 %v1497_v55 }
 0x10e   :  { %1195 = vmatmul.bf16.gmra.mxu2 %v1501_v56 }
 0x10f   :  { %v1014_v61 = vpop.f32.mrf.mxu3 }
 0x110   :  { %v2059_v63 = vadd.f32 %v1014_v61, %v2018_v43  ;;  %v1070_v43 = vpop.f32.mrf.mxu0 }
 0x111   :  { %v995_v62 = vpop.f32.mrf.mxu2 }
 0x112   :  { %v2062_v1 = vadd.f32 %v995_v62, %v947_v59  ;;  %v948_v3 = vpop.f32.mrf.mxu1 }
 0x113   :  { %v949_v4 = vadd.f32 %v948_v3, %v900_v0 }
 0x117   :  { %v1016_v7 = vpop.f32.mrf.mxu3 }
 0x118   :  { %v2065_v10 = vadd.f32 %v1016_v7, %v2021_v60  ;;  %v1073_v24 = vpop.f32.mrf.mxu0 }
 0x119   :  { %v997_v9 = vpop.f32.mrf.mxu2 }
 0x11a   :  { %v2068_v12 = vadd.f32 %v997_v9, %v949_v4  ;;  %v951_v13 = vpop.f32.mrf.mxu1 }
 0x11b   :  { %v952_v14 = vadd.f32 %v951_v13, %v903_v11 }
 0x11f   :  { %v1019_v15 = vpop.f32.mrf.mxu3 }
 0x120   :  { %v1020_v18 = vadd.f32 %v1019_v15, %v2024_v6  ;;  %v1075_v34 = vpop.f32.mrf.mxu0 }
 0x121   :  { %v1000_v16 = vpop.f32.mrf.mxu2 }
 0x122   :  { %v2072_v20 = vadd.f32 %v1000_v16, %v952_v14  ;;  %v953_v21 = vpop.f32.mrf.mxu1  ;;  %v1069_v28 = vadd.f32 %v1068_v2, %v1020_v18 }
 0x123   :  { %v954_v22 = vadd.f32 %v953_v21, %v905_v19 }
 0x127   :  { %v1021_v60 = vpop.f32.mrf.mxu3 }
 0x128   :  { %v1022_v26 = vadd.f32 %v1021_v60, %v2028_v25  ;;  %v1078_v46 = vpop.f32.mrf.mxu0 }
 0x129   :  { %v1002_v23 = vpop.f32.mrf.mxu2 }
 0x12a   :  { %v2075_v27 = vadd.f32 %v1002_v23, %v954_v22  ;;  %v1117_v29 = vpop.f32.mrf.mxu1  ;;  %v1071_v36 = vadd.f32 %v1070_v43, %v1022_v26 }
 0x12b   :  { %v1118_v30 = vadd.f32 %v1117_v29, %v1069_v28 }
 0x12f   :  { %v1024_v33 = vpop.f32.mrf.mxu3 }
 0x130   :  { %v1025_v6 = vadd.f32 %v1024_v33, %v2031_v32  ;;  %v1080_v59 = vpop.f32.mrf.mxu0 }
 0x131   :  { %v1166_v35 = vpop.f32.mrf.mxu2 }
 0x132   :  { %v2078_v5 = vadd.f32 %v1166_v35, %v1118_v30  ;;  %v1119_v38 = vpop.f32.mrf.mxu1  ;;  %v1074_v45 = vadd.f32 %v1073_v24, %v1025_v6 }
 0x133   :  { %v1120_v39 = vadd.f32 %v1119_v38, %v1071_v36 }
 0x137   :  { %v1026_v40 = vpop.f32.mrf.mxu3 }
 0x138   :  { %v1027_v42 = vadd.f32 %v1026_v40, %v2034_v49  ;;  %v1083_v7 = vpop.f32.mrf.mxu0 }
 0x139   :  { %v1168_v44 = vpop.f32.mrf.mxu2 }
 0x13a   :  { %v2081_v25 = vadd.f32 %v1168_v44, %v1120_v39  ;;  %v1122_v47 = vpop.f32.mrf.mxu1  ;;  %v1076_v55 = vadd.f32 %v1075_v34, %v1027_v42 }
 0x13b   :  { %v1123_v48 = vadd.f32 %v1122_v47, %v1074_v45 }
 0x13f   :  { %v1029_v50 = vpop.f32.mrf.mxu3 }
 0x140   :  { %v1030_v52 = vadd.f32 %v1029_v50, %v2037_v57  ;;  %v1085_v18 = vpop.f32.mrf.mxu0 }
 0x141   :  { %v1171_v32 = vpop.f32.mrf.mxu2 }
 0x142   :  { %v2084_v53 = vadd.f32 %v1171_v32, %v1123_v48  ;;  %v1124_v56 = vpop.f32.mrf.mxu1  ;;  %v1079_v2 = vadd.f32 %v1078_v46, %v1030_v52 }
 0x143   :  { %v1125_v58 = vadd.f32 %v1124_v56, %v1076_v55 }
 0x147   :  { %v1031_v61 = vpop.f32.mrf.mxu3 }
 0x148   :  { %v1032_v49 = vadd.f32 %v1031_v61, %v2039_v8  ;;  %v1088_v29 = vpop.f32.mrf.mxu0 }
 0x149   :  { %v1173_v62 = vpop.f32.mrf.mxu2 }
 0x14a   :  { %v2087_v0 = vadd.f32 %v1173_v62, %v1125_v58  ;;  %v1127_v3 = vpop.f32.mrf.mxu1  ;;  %v1081_v14 = vadd.f32 %v1080_v59, %v1032_v49 }
 0x14b   :  { %v1128_v4 = vadd.f32 %v1127_v3, %v1079_v2 }
 0x14f   :  { %v1034_v9 = vpop.f32.mrf.mxu3 }
 0x150   :  { %v1035_v57 = vadd.f32 %v1034_v9, %v2043_v17  ;;  %v1090_v38 = vpop.f32.mrf.mxu0 }
 0x151   :  { %v1176_v11 = vpop.f32.mrf.mxu2 }
 0x152   :  { %v2090_v13 = vadd.f32 %v1176_v11, %v1128_v4  ;;  %v1129_v43 = vpop.f32.mrf.mxu1  ;;  %v1084_v22 = vadd.f32 %v1083_v7, %v1035_v57 }
 0x153   :  { %v1130_v15 = vadd.f32 %v1129_v43, %v1081_v14 }
 0x157   :  { %v1036_v16 = vpop.f32.mrf.mxu3 }
 0x158   :  { %v1037_v8 = vadd.f32 %v1036_v16, %v2046_v31  ;;  %v1093_v42 = vpop.f32.mrf.mxu0 }
 0x159   :  { %v1178_v19 = vpop.f32.mrf.mxu2 }
 0x15a   :  { %v2093_v21 = vadd.f32 %v1178_v19, %v1130_v15  ;;  %v1132_v24 = vpop.f32.mrf.mxu1  ;;  %v1086_v17 = vadd.f32 %v1085_v18, %v1037_v8 }
 0x15b   :  { %v1133_v60 = vadd.f32 %v1132_v24, %v1084_v22 }
 0x15f   :  { %v1039_v23 = vpop.f32.mrf.mxu3 }
 0x160   :  { %v1095_v47 = vpop.f32.mrf.mxu0 }
 0x161   :  { %v1181_v26 = vpop.f32.mrf.mxu2 }
 0x162   :  { %v2095_v28 = vadd.f32 %v1181_v26, %v1133_v60  ;;  %v1134_v30 = vpop.f32.mrf.mxu1 }
 0x163   :  { %v1135_v33 = vadd.f32 %v1134_v30, %v1086_v17 }
 0x167   :  { %v1041_v34 = vpop.f32.mrf.mxu3 }
 0x168   :  { %v1098_v55 = vpop.f32.mrf.mxu0 }
 0x169   :  { %v1183_v6 = vpop.f32.mrf.mxu2 }
 0x16a   :  { %v1184_v35 = vadd.f32 %v1183_v6, %v1135_v33  ;;  %v1137_v36 = vpop.f32.mrf.mxu1 }
 0x16f   :  { %v1044_v31 = vpop.f32.mrf.mxu3 }
 0x170   :  { %v1100_v62 = vpop.f32.mrf.mxu0  ;;  %v1045_v43 = vadd.f32 %v1044_v31, %v2062_v1 }
 0x171   :  { %v1186_v39 = vpop.f32.mrf.mxu2 }
 0x172   :  { %v1139_v40 = vpop.f32.mrf.mxu1 }
 0x177   :  { %v1046_v45 = vpop.f32.mrf.mxu3 }
 0x178   :  { %v1047_v4 = vadd.f32 %v1046_v45, %v2068_v12  ;;  %v1040_v12 = vadd.f32 %v1039_v23, %v2051_v41  ;;  %v1209_v41 = vmax.f32 %v2095_v28, 0.0  ;;  %v1066_v28 = vadd.f32 %v2053_v51, %v2065_v10  ;;  %v1217_v51 = vld [vmem:[%s2126_s3] sm:$0x1]  ;;  %s1959_s3 = smov [#allocation8]  }
 0x179   :  { %v1188_v44 = vpop.f32.mrf.mxu2  ;;  %v1219_v10 = vstv %s2127_s4  ;;  %s1265_s10 = sshll.u32 %s1959_s3, 4  ;;  %s1267_s4 = sshll.u32 %s2128_s5, 4  ;;  %s1266_s10 = int_to_ptr.vmem [resolvable:$true] %s1265_s10  ;;  %s1268_s4 = int_to_ptr.hbm [resolvable:$true] %s1267_s4 }
 0x17a   :  { %v1142_v46 = vpop.f32.mrf.mxu1  ;;  %v1096_v15 = vadd.f32 %v1095_v47, %v1047_v4  ;;  %v1089_v1 = vadd.f32 %v1088_v29, %v1040_v12  ;;  %v1207_v29 = vmax.f32 %v2090_v13, 0.0  ;;  %v1064_v13 = vadd.f32 %v2048_v37, %v2059_v63 }
 0x17c   :  { %v1138_v31 = vadd.f32 %v1137_v36, %v1089_v1 }
 0x17e   :  { %v1187_v45 = vadd.f32 %v1186_v39, %v1138_v31  ;;  %v1206_v39 = vmax.f32 %v2087_v0, 0.0 }
 0x17f   :  { %v1049_v52 = vpop.f32.mrf.mxu3 }
 0x180   :  { %v1050_v49 = vadd.f32 %v1049_v52, %v2072_v20  ;;  %v1094_v20 = vadd.f32 %v1093_v42, %v1045_v43  ;;  %v1210_v42 = vmax.f32 %v1184_v35, 0.0  ;;  %v1204_v35 = vmax.f32 %v2081_v25, 0.0 }
 0x181   :  { %v1191_v48 = vpop.f32.mrf.mxu2 }
 0x182   :  { %v1144_v50 = vpop.f32.mrf.mxu1  ;;  %v1099_v7 = vadd.f32 %v1098_v55, %v1050_v49  ;;  %v1143_v24 = vadd.f32 %v1142_v46, %v1094_v20 }
 0x183   :  { %v1145_v8 = vadd.f32 %v1144_v50, %v1096_v15 }
 0x184   :  { %v1192_v26 = vadd.f32 %v1191_v48, %v1143_v24 }
 0x186   :  { %v1213_v6 = vmax.f32 %v1192_v26, 0.0 }
 0x187   :  { %v1051_v58 = vpop.f32.mrf.mxu3 }
 0x188   :  { %v1052_v61 = vadd.f32 %v1051_v58, %v2075_v27  ;;  %v1042_v27 = vadd.f32 %v1041_v34, %v2056_v54  ;;  %v1112_v54 = vpop.f32.mrf.mxu0  ;;  %v1211_v34 = vmax.f32 %v1187_v45, 0.0 }
 0x189   :  { %v1193_v32 = vpop.f32.mrf.mxu2  ;;  %v1113_v50 = vadd.f32 %v1112_v54, %v1064_v13 }
 0x18a   :  { %v1147_v56 = vpop.f32.mrf.mxu1  ;;  %v1101_v3 = vadd.f32 %v1100_v62, %v1052_v61  ;;  %v1194_v19 = vadd.f32 %v1193_v32, %v1145_v8  ;;  %v1091_v60 = vadd.f32 %v1090_v38, %v1042_v27  ;;  %v1208_v38 = vmax.f32 %v2093_v21, 0.0 }
 0x18b   :  { %v1148_v11 = vadd.f32 %v1147_v56, %v1099_v7  ;;  %v1203_v21 = vmax.f32 %v2078_v5, 0.0 }
 0x18c   :  { %v1214_v17 = vmax.f32 %v1194_v19, 0.0  ;;  %v1140_v30 = vadd.f32 %v1139_v40, %v1091_v60  ;;  %v1205_v40 = vmax.f32 %v2084_v53, 0.0 }
 0x18e   :  { %v1189_v33 = vadd.f32 %v1188_v44, %v1140_v30 }
 0x190   :  { %v1212_v47 = vmax.f32 %v1189_v33, 0.0  ;;  %v1114_v23 = vpop.f32.mrf.mxu0 }
 0x191   :  { %v1196_v59 = vpop.f32.mrf.mxu2  ;;  %v1115_v46 = vadd.f32 %v1114_v23, %v1066_v28 }
 0x192   :  { %v1149_v2 = vpop.f32.mrf.mxu1  ;;  %v1197_v16 = vadd.f32 %v1196_v59, %v1148_v11 }
 0x193   :  { %v1150_v9 = vadd.f32 %v1149_v2, %v1101_v3 }
 0x194   :  { %v1215_v22 = vmax.f32 %v1197_v16, 0.0 }
 0x198   :  { %v1161_v36 = vpop.f32.mrf.mxu0 }
 0x199   :  { %v1198_v57 = vpop.f32.mrf.mxu2  ;;  %v1162_v0 = vadd.f32 %v1161_v36, %v1113_v50 }
 0x19a   :  { %v1199_v14 = vadd.f32 %v1198_v57, %v1150_v9 }
 0x19b   :  { %v1201_v53 = vmax.f32 %v1162_v0, 0.0 }
 0x19c   :  { %v1216_v18 = vmax.f32 %v1199_v14, 0.0 }
 0x19e   :  { %1220 = vmatpush.xpose.msra.mxu3 %v1216_v18 }
 0x1a0   :  { %v1163_v44 = vpop.f32.mrf.mxu0 }
 0x1a1   :  { %v1164_v48 = vadd.f32 %v1163_v44, %v1115_v46 }
 0x1a2   :  { %1221 = vmatpush.xpose.msra.mxu3 %v1215_v22 }
 0x1a3   :  { %v1202_v52 = vmax.f32 %v1164_v48, 0.0 }
 0x1a6   :  { %1222 = vmatpush.xpose.msra.mxu3 %v1214_v17 }
 0x1aa   :  { %1223 = vmatpush.xpose.msra.mxu3 %v1213_v6 }
 0x1ae   :  { %1224 = vmatpush.xpose.msra.mxu3 %v1212_v47 }
 0x1b2   :  { %1225 = vmatpush.xpose.msra.mxu3 %v1211_v34 }
 0x1b6   :  { %1226 = vmatpush.xpose.msra.mxu3 %v1210_v42 }
 0x1ba   :  { %1227 = vmatpush.xpose.msra.mxu3 %v1209_v41 }
 0x1be   :  { %1228 = vmatpush.xpose.msra.mxu3 %v1208_v38 }
 0x1c2   :  { %1229 = vmatpush.xpose.msra.mxu3 %v1207_v29 }
 0x1c6   :  { %1230 = vmatpush.xpose.msra.mxu3 %v1206_v39 }
 0x1ca   :  { %1231 = vmatpush.xpose.msra.mxu3 %v1205_v40 }
 0x1ce   :  { %1232 = vmatpush.xpose.msra.mxu3 %v1204_v35 }
 0x1d2   :  { %1233 = vmatpush.xpose.msra.mxu3 %v1203_v21 }
 0x1d6   :  { %1234 = vmatpush.xpose.msra.mxu3 %v1202_v52 }
 0x1da   :  { %1235 = vmatpush.xpose.msra.mxu3 %v1201_v53 }
 0x1dd   :  { %1236 = vmatmul.f32.vlgmr.msra.gmra.mxu3 %v1217_v51 }
 0x260   :  { %v1237_v5 = vpop.f32.mrf.mxu3 }
 0x261   :  { %v1238_v25 = vadd.f32 %v1237_v5, %v1219_v10 }
 0x263   :  { %v1726_v37 = vmul.f32 -1.442695, %v1238_v25 }
 0x265   :  { %1871 = vpow2.f32 %v1726_v37 }
 0x26b   :  { %v1872_v63 = vpop.eup %1871 }
 0x26c   :  { %v1243_v32 = vadd.f32 1.0, %v1872_v63 }
 0x26e   :  { %1873 = vrcp.f32 %v1243_v32  ;;  %v1255_v59 = vand.u32 2147483648, %v1243_v32  ;;  %v1253_v49 = vand.u32 2147483647, %v1243_v32  ;;  %vm1249_vm1 = vweird.f32 %v1243_v32 }
 0x270   :  { %v1256_v2 = vor.u32 1.1754944e-38, %v1255_v59  ;;  %vm1254_vm3 = vcmp.eq.f32.partialorder %v1253_v49, 8.507059e+37 }
 0x274   :  { %v1874_v55 = vpop.eup %1873 }
 0x275   :  { %v1245_v56 = vmul.f32 %v1874_v55, %v1243_v32  ;;  %vm1250_vm0 = vweird.f32 %v1874_v55 }
 0x276   :  { %vm1251_vm2 = vmor %vm1249_vm1, %vm1250_vm0 }
 0x277   :  { %v1246_v58 = vsub.f32 1.0, %v1245_v56 }
 0x279   :  { %v1247_v61 = vmul.f32 %v1874_v55, %v1246_v58 }
 0x27b   :  { %v1248_v62 = vadd.f32 %v1874_v55, %v1247_v61 }
 0x27d   :  { %v1252_v3 = vsel %vm1251_vm2, %v1874_v55, %v1248_v62 }
 0x27e   :  { %v1257_v4 = vsel %vm1254_vm3, %v1256_v2, %v1252_v3 }
 0x27f   :  { %1259 = vst [vmem:[#allocation8] sm:$0x1] %v1257_v4 }
 0x280   :  { %1270 = dma.vmem_to_hbm [thread:$0]  %s1266_s10, 16, %s1268_s4, [#allocation5]  }
 0x281   :  { %1951 = dma.done.wait [#allocation5], 16  }
 0x282   :  { %1952 = vsyncadd [#allocation5], 4294967280 }
 0x283   :  { %1275 = vsyncpa [#allocation4], 1 }
 0x284   :  { %1276 = vsyncpa [#allocation7], 1 }
 0x285   :  { %1277 = vsyncpa [#allocation5], 1 }

</bundles_post_ra>
